<compile_context>
chip_gen: v5e
topology: v5e:2x2
jax: 0.10.0
libtpu: 0.0.40
codegen_flags: <defaults>
</compile_context>

<pallas_src>
import functools
import math

import jax
import jax.numpy as jnp
from jax import lax
from jax.experimental import pallas as pl
from jax.experimental.pallas import tpu as pltpu

# Keep the XLA reference matmuls in full f32 so the check is meaningful.
jax.config.update("jax_default_matmul_precision", "float32")

# v7x has 64 MiB physical VMEM per TensorCore -> cap the scoped limit at 48 MiB
# (also fine on v5e/v6e, which have 128 MiB).
_VMEM_LIMIT = 48 * 1024 * 1024
# Budget used to decide whether the whole K reduction fits in one tile
# (double-buffered X + W tiles + double-buffered output block), with headroom.
_TILE_VMEM_BUDGET = 36 * 1024 * 1024


def _round_up(x, m):
    return ((x + m - 1) // m) * m


def _pick_tile(padded, max_tile, granularity):
    """Largest multiple of `granularity` that divides `padded` and is <= max_tile."""
    c = padded // granularity
    best = 1
    for d in range(1, c + 1):
        if c % d == 0 and d * granularity <= max_tile:
            best = d
    return best * granularity


# ----------------------------------------------------------------------------
# Fused linear: activation(x @ W + b), W in (K, N) kernel layout (bf16)
# ----------------------------------------------------------------------------
def _linear_kernel(x_ref, w_ref, b_ref, o_ref, *, activation):
    k = pl.program_id(2)

    # Resident f32 output block initialized with the broadcast bias (bias add
    # folded into the accumulator init; no separate scratch accumulator).
    @pl.when(k == 0)
    def _():
        o_ref[...] = jnp.broadcast_to(b_ref[...], o_ref.shape).astype(o_ref.dtype)

    x = x_ref[...]
    w = w_ref[...]
    if w.dtype != x.dtype:
        x = x.astype(w.dtype)  # bf16 MXU inputs; accumulation below stays f32.

    o_ref[...] += jnp.dot(x, w, preferred_element_type=jnp.float32)

    @pl.when(k == pl.num_programs(2) - 1)
    def _():
        y = o_ref[...]
        if activation == "relu":
            y = jnp.maximum(y, 0.0)
        elif activation == "gelu":  # tanh-approx GELU (matches jax.nn.gelu(approximate=True))
            c = jnp.float32(0.7978845608028654)
            y = 0.5 * y * (1.0 + jnp.tanh(c * (y + 0.044715 * y * y * y)))
        elif activation == "tanh":
            y = jnp.tanh(y)
        o_ref[...] = y


def fused_linear(x, weight, bias, activation="none", *, tm=256, tn=256, tk=512):
    """activation(x @ weight + bias)

    x      : (..., K) float32
    weight : (K, N)   kernel layout (pre-transposed once at init from nn.Linear's
                      (N, K)), typically bfloat16 so the weight DMA is halved.
    bias   : (N,)     float32
    """
    lead = x.shape[:-1]
    K = x.shape[-1]
    Kw, N = weight.shape
    assert Kw == K
    x2 = x.reshape(-1, K)
    M = x2.shape[0]

    Mp = _round_up(M, 8)
    Kp = _round_up(K, 128)
    Np = _round_up(N, 128)

    tm_e = _pick_tile(Mp, tm, 8)
    m_blocks = Mp // tm_e

    # Keep >=2 blocks along a parallel axis when M has a single block, so v7x's
    # second TensorCore is not idle.
    cap_n = tn
    if m_blocks < 2 and Np // 128 >= 2:
        cap_n = min(tn, Np // 2)
    tn_e = _pick_tile(Np, cap_n, 128)

    # Collapse the K reduction into a single tile whenever the double-buffered
    # X/W tiles plus the output blocks fit the VMEM budget: removes the per-k
    # read-modify-write of the f32 output block and the per-grid-step overhead.
    wbytes = jnp.dtype(weight.dtype).itemsize
    full_k_bytes = 2 * (tm_e * Kp * 4 + tn_e * Kp * wbytes) + 2 * tm_e * tn_e * 4
    if full_k_bytes <= _TILE_VMEM_BUDGET:
        tk_e = Kp
    else:
        tk_e = _pick_tile(Kp, tk, 128)

    if (Mp, Kp) != (M, K):
        x2 = jnp.pad(x2, ((0, Mp - M), (0, Kp - K)))
    w = weight
    if (Kp, Np) != (K, N):
        # No-op for demo and BERT-real dims (already multiples of 128); fallback only.
        # TODO(synk): pre-pad weights at init if a config ever needs padding here.
        w = jnp.pad(w, ((0, Kp - K), (0, Np - N)))
    b2 = bias.reshape(1, N).astype(jnp.float32)
    if Np != N:
        b2 = jnp.pad(b2, ((0, 0), (0, Np - N)))

    grid = (Mp // tm_e, Np // tn_e, Kp // tk_e)

    out = pl.pallas_call(
        functools.partial(_linear_kernel, activation=activation),
        out_shape=jax.ShapeDtypeStruct((Mp, Np), jnp.float32),
        grid_spec=pltpu.PrefetchScalarGridSpec(
            num_scalar_prefetch=0,
            grid=grid,
            in_specs=[
                pl.BlockSpec((tm_e, tk_e), lambda i, j, k: (i, k)),   # X tile (f32)
                pl.BlockSpec((tk_e, tn_e), lambda i, j, k: (k, j)),   # W tile (K,N bf16)
                pl.BlockSpec((1, tn_e), lambda i, j, k: (0, j)),      # bias (k-invariant)
            ],
            out_specs=pl.BlockSpec((tm_e, tn_e), lambda i, j, k: (i, j)),
        ),
        compiler_params=pltpu.CompilerParams(
            dimension_semantics=("parallel", "parallel", "arbitrary"),
            vmem_limit_bytes=_VMEM_LIMIT,
        ),
    )(x2, w, b2)

    if (Mp, Np) != (M, N):
        out = out[:M, :N]
    return out.reshape(*lead, N)


# ----------------------------------------------------------------------------
# LayerNorm over the last dim, with the residual add fused in-kernel
# ----------------------------------------------------------------------------
def _layer_norm_kernel(*refs, eps, has_residual):
    if has_residual:
        x_ref, r_ref, g_ref, b_ref, o_ref = refs
        x = x_ref[...] + r_ref[...]
    else:
        x_ref, g_ref, b_ref, o_ref = refs
        x = x_ref[...]
    mean = jnp.mean(x, axis=-1, keepdims=True)
    xc = x - mean
    var = jnp.mean(xc * xc, axis=-1, keepdims=True)
    inv = lax.rsqrt(var + eps)
    o_ref[...] = (xc * inv * g_ref[...] + b_ref[...]).astype(o_ref.dtype)


def layer_norm(x, gamma, beta, *, residual=None, eps=1e-12, tm=256):
    """LayerNorm(x + residual) over the last dim (residual add fused in-kernel)."""
    orig_shape = x.shape
    H = x.shape[-1]
    x2 = x.reshape(-1, H)
    M = x2.shape[0]
    Mp = _round_up(M, 8)
    tm_e = _pick_tile(Mp, tm, 8)
    if Mp != M:
        x2 = jnp.pad(x2, ((0, Mp - M), (0, 0)))

    inputs = [x2]
    in_specs = [pl.BlockSpec((tm_e, H), lambda i: (i, 0))]
    if residual is not None:
        r2 = residual.reshape(-1, H)
        if Mp != M:
            r2 = jnp.pad(r2, ((0, Mp - M), (0, 0)))
        inputs.append(r2)
        in_specs.append(pl.BlockSpec((tm_e, H), lambda i: (i, 0)))
    inputs += [gamma.reshape(1, H), beta.reshape(1, H)]
    in_specs += [pl.BlockSpec((1, H), lambda i: (0, 0)),
                 pl.BlockSpec((1, H), lambda i: (0, 0))]

    out = pl.pallas_call(
        functools.partial(_layer_norm_kernel, eps=eps,
                          has_residual=residual is not None),
        out_shape=jax.ShapeDtypeStruct((Mp, H), x.dtype),
        grid_spec=pltpu.PrefetchScalarGridSpec(
            num_scalar_prefetch=0,
            grid=(Mp // tm_e,),
            in_specs=in_specs,
            out_specs=pl.BlockSpec((tm_e, H), lambda i: (i, 0)),
        ),
        compiler_params=pltpu.CompilerParams(
            dimension_semantics=("parallel",),
            vmem_limit_bytes=_VMEM_LIMIT,
        ),
    )(*inputs)
    return out[:M].reshape(orig_shape)


# ----------------------------------------------------------------------------
# Multi-head self-attention on packed QKV: softmax(QK^T / sqrt(D)) V
# ----------------------------------------------------------------------------
def _attention_kernel(qkv_ref, o_ref, *, num_heads, hidden, scale):
    qkv = qkv_ref[0]                       # (S, 3H): heads contiguous on the lane axis
    q = qkv[:, :hidden]
    k = qkv[:, hidden:2 * hidden]
    v = qkv[:, 2 * hidden:]
    D = hidden // num_heads
    ctx = []
    # TODO(synk): padding attention_mask not applied (demo uses full-length
    # sequences); for long S, block the KV axis with an online-softmax (flash)
    # pattern instead of materializing the full SxS score matrix.
    for h in range(num_heads):             # static unroll; no XLA head transposes
        qh = q[:, h * D:(h + 1) * D]
        kh = k[:, h * D:(h + 1) * D]
        vh = v[:, h * D:(h + 1) * D]
        s = lax.dot_general(qh, kh, (((1,), (1,)), ((), ())),
                            preferred_element_type=jnp.float32) * scale
        m = jnp.max(s, axis=-1, keepdims=True)
        e = jnp.exp(s - m)
        denom = jnp.sum(e, axis=-1, keepdims=True)
        p = e * pl.reciprocal(denom, approx=True)    # EUP divide, frees VALU slots
        ctx.append(jnp.dot(p, vh, preferred_element_type=jnp.float32))
    # Single full-H, lane-dense store (no masked vst).
    o_ref[0] = jnp.concatenate(ctx, axis=-1).astype(o_ref.dtype)


def multi_head_attention(qkv, num_heads):
    """softmax(QK^T/sqrt(D)) V on packed (B, S, 3H) QKV -> (B, S, H)."""
    B, S, H3 = qkv.shape
    H = H3 // 3
    D = H // num_heads
    scale = 1.0 / math.sqrt(D)

    return pl.pallas_call(
        functools.partial(_attention_kernel, num_heads=num_heads, hidden=H, scale=scale),
        out_shape=jax.ShapeDtypeStruct((B, S, H), jnp.float32),
        grid_spec=pltpu.PrefetchScalarGridSpec(
            num_scalar_prefetch=0,
            grid=(B,),
            in_specs=[pl.BlockSpec((1, S, H3), lambda b: (b, 0, 0))],
            out_specs=pl.BlockSpec((1, S, H), lambda b: (b, 0, 0)),
        ),
        compiler_params=pltpu.CompilerParams(
            dimension_semantics=("parallel",),
            vmem_limit_bytes=_VMEM_LIMIT,
        ),
    )(qkv)


# ----------------------------------------------------------------------------
# Model: BERT-style encoder; forward returns the pooled output (== output[1])
# ----------------------------------------------------------------------------
CONFIG = dict(
    vocab_size=1000,
    hidden_size=128,
    num_layers=2,
    num_heads=4,
    intermediate_size=256,
    max_position=64,
    num_segments=4,      # mirrors TransformerEncoder._init_segment_embeddings
    layer_norm_eps=1e-12,
)


def init_params(key, cfg):
    """Deterministic BERT-style parameters in PyTorch nn.Linear layout (N, K), f32."""
    H, I = cfg["hidden_size"], cfg["intermediate_size"]
    ks = jax.random.split(key, 8 + cfg["num_layers"])

    def nrm(k, shape, scale=0.02):
        return jax.random.normal(k, shape, dtype=jnp.float32) * scale

    params = {}
    params["word_emb"] = nrm(ks[0], (cfg["vocab_size"], H))
    params["pos_emb"] = nrm(ks[1], (cfg["max_position"], H))

    # _init_segment_embeddings: extend the 2-row token-type table to num_segments,
    # rows [2, num_segments-1) set to the mean of the original rows.
    tok2 = nrm(ks[2], (2, H))
    num_seg = cfg["num_segments"]
    new_tok = nrm(ks[3], (num_seg, H))
    new_tok = new_tok.at[:2].set(tok2)
    mean_row = tok2.mean(axis=0)
    for idx in range(2, num_seg - 1):
        new_tok = new_tok.at[idx].set(mean_row)
    params["tok_type_emb"] = new_tok

    params["emb_ln_g"] = 1.0 + nrm(ks[4], (H,), 0.1)
    params["emb_ln_b"] = nrm(ks[5], (H,), 0.1)

    layers = []
    for li in range(cfg["num_layers"]):
        lk = jax.random.split(ks[8 + li], 16)
        layers.append(dict(
            wq=nrm(lk[0], (H, H)), bq=nrm(lk[1], (H,)),
            wk=nrm(lk[2], (H, H)), bk=nrm(lk[3], (H,)),
            wv=nrm(lk[4], (H, H)), bv=nrm(lk[5], (H,)),
            wo=nrm(lk[6], (H, H)), bo=nrm(lk[7], (H,)),
            ln1_g=1.0 + nrm(lk[8], (H,), 0.1), ln1_b=nrm(lk[9], (H,), 0.1),
            w1=nrm(lk[10], (I, H)), b1=nrm(lk[11], (I,)),
            w2=nrm(lk[12], (H, I)), b2=nrm(lk[13], (H,)),
            ln2_g=1.0 + nrm(lk[14], (H,), 0.1), ln2_b=nrm(lk[15], (H,), 0.1),
        ))
    params["layers"] = layers

    params["wp"] = nrm(ks[6], (H, H))   # pooler
    params["bp"] = nrm(ks[7], (H,))
    return params


def prepare_params(params, *, weight_dtype=jnp.bfloat16):
    """One-time conversion to kernel layout (done once at init, not per call).

    * Linear weights transposed to (K, N) so the in-kernel contraction is a plain
      [M,K]x[K,N] MXU matmul (no per-tile transpose), and cast to bf16 so the
      HBM->VMEM weight DMA halves (accumulation stays f32 in-kernel).
    * Q/K/V weights/biases concatenated so the QKV projection is a single
      fused_linear call (1 launch, activation read from HBM once).
    """
    wd = weight_dtype
    prep = dict(
        word_emb=params["word_emb"],
        pos_emb=params["pos_emb"],
        tok_type_emb=params["tok_type_emb"],
        emb_ln_g=params["emb_ln_g"], emb_ln_b=params["emb_ln_b"],
        wp=params["wp"].T.astype(wd), bp=params["bp"],
    )
    layers = []
    for l in params["layers"]:
        wqkv = jnp.concatenate([l["wq"], l["wk"], l["wv"]], axis=0).T.astype(wd)  # (H, 3H)
        bqkv = jnp.concatenate([l["bq"], l["bk"], l["bv"]], axis=0)
        layers.append(dict(
            wqkv=wqkv, bqkv=bqkv,
            wo=l["wo"].T.astype(wd), bo=l["bo"],
            ln1_g=l["ln1_g"], ln1_b=l["ln1_b"],
            w1=l["w1"].T.astype(wd), b1=l["b1"],
            w2=l["w2"].T.astype(wd), b2=l["b2"],
            ln2_g=l["ln2_g"], ln2_b=l["ln2_b"],
        ))
    prep["layers"] = layers
    return prep


def transformer_encoder_forward(prep, input_ids, token_type_ids, cfg):
    nH, eps = cfg["num_heads"], cfg["layer_norm_eps"]
    B, S = input_ids.shape

    # TODO(synk): embedding-table gathers stay in XLA (data-dependent row gather
    # is not worth a Pallas DMA gather at these sizes).
    emb = (jnp.take(prep["word_emb"], input_ids, axis=0)
           + prep["pos_emb"][None, :S, :]
           + jnp.take(prep["tok_type_emb"], token_type_ids, axis=0))
    h = layer_norm(emb, prep["emb_ln_g"], prep["emb_ln_b"], eps=eps)

    for layer in prep["layers"]:
        # Fused QKV projection: one kernel launch, h read once; packed QKV goes
        # straight into the attention kernel (no XLA split / head transposes).
        qkv = fused_linear(h, layer["wqkv"], layer["bqkv"])
        ctx = multi_head_attention(qkv, nH)
        attn_out = fused_linear(ctx, layer["wo"], layer["bo"])
        h = layer_norm(attn_out, layer["ln1_g"], layer["ln1_b"], residual=h, eps=eps)

        inter = fused_linear(h, layer["w1"], layer["b1"], activation="gelu")
        ffn_out = fused_linear(inter, layer["w2"], layer["b2"])
        h = layer_norm(ffn_out, layer["ln2_g"], layer["ln2_b"], residual=h, eps=eps)

    # Pooler on the [CLS] token -> this is BertModel output[1], what forward() returns.
    # TODO(synk): at demo batch this launch is overhead-bound; it amortizes at real batch.
    pooled = fused_linear(h[:, 0, :], prep["wp"], prep["bp"], activation="tanh")
    return pooled


# ----------------------------------------------------------------------------
# Pure-JAX reference (same bf16-stored weights, f32 math)
# ----------------------------------------------------------------------------
def reference_forward(prep, input_ids, token_type_ids, cfg):
    H, nH, eps = cfg["hidden_size"], cfg["num_heads"], cfg["layer_norm_eps"]
    B, S = input_ids.shape
    D = H // nH

    def ln(x, g, b):
        m = x.mean(-1, keepdims=True)
        v = ((x - m) ** 2).mean(-1, keepdims=True)
        return (x - m) * lax.rsqrt(v + eps) * g + b

    def lin(x, w, b):
        return x @ w.astype(jnp.float32) + b

    emb = (prep["word_emb"][input_ids] + prep["pos_emb"][None, :S, :]
           + prep["tok_type_emb"][token_type_ids])
    h = ln(emb, prep["emb_ln_g"], prep["emb_ln_b"])

    for layer in prep["layers"]:
        qkv = lin(h, layer["wqkv"], layer["bqkv"])
        q, k, v = qkv[..., :H], qkv[..., H:2 * H], qkv[..., 2 * H:]

        def heads(x):
            return x.reshape(B, S, nH, D).transpose(0, 2, 1, 3)

        qh, kh, vh = heads(q), heads(k), heads(v)
        s = jnp.einsum("bhqd,bhkd->bhqk", qh, kh) / math.sqrt(D)
        p = jax.nn.softmax(s, axis=-1)
        ctx = jnp.einsum("bhqk,bhkd->bhqd", p, vh).transpose(0, 2, 1, 3).reshape(B, S, H)
        attn_out = lin(ctx, layer["wo"], layer["bo"])
        h = ln(h + attn_out, layer["ln1_g"], layer["ln1_b"])

        inter = jax.nn.gelu(lin(h, layer["w1"], layer["b1"]), approximate=True)
        ffn = lin(inter, layer["w2"], layer["b2"])
        h = ln(h + ffn, layer["ln2_g"], layer["ln2_b"])

    return jnp.tanh(lin(h[:, 0, :], prep["wp"], prep["bp"]))


if __name__ == "__main__":
    cfg = CONFIG
    key = jax.random.PRNGKey(0)
    k_params, k_ids, k_seg = jax.random.split(key, 3)

    params = init_params(k_params, cfg)
    prep = prepare_params(params)   # one-time weight transpose / QKV concat / bf16 cast

    B, S = 2, 8
    input_ids = jax.random.randint(k_ids, (B, S), 0, cfg["vocab_size"], dtype=jnp.int32)
    token_type_ids = jax.random.randint(k_seg, (B, S), 0, cfg["num_segments"], dtype=jnp.int32)

    pooled = transformer_encoder_forward(prep, input_ids, token_type_ids, cfg)
    pooled = jax.block_until_ready(pooled)

    ref = reference_forward(prep, input_ids, token_type_ids, cfg)
    assert pooled.shape == (B, cfg["hidden_size"])
    max_err = float(jnp.max(jnp.abs(pooled - ref)))
    # Kernel path uses bf16 MXU inputs (f32 accumulation) + approx reciprocal in
    # the softmax; reference is f32 on the same bf16-stored weights.
    assert jnp.allclose(pooled, ref, atol=1e-2, rtol=1e-2), f"max_err={max_err}"

    print("KERNEL_OK")
</pallas_src>

<mosaic_0001>
module attributes {stable_mosaic.version = 11 : i64} {
  func.func @_layer_norm_kernel(%arg0: i32, %arg1: memref<16x128xf32, #tpu.memory_space<vmem>>, %arg2: memref<1x128xf32, #tpu.memory_space<vmem>>, %arg3: memref<1x128xf32, #tpu.memory_space<vmem>>, %arg4: memref<16x128xf32, #tpu.memory_space<vmem>>) attributes {dimension_semantics = [#tpu.dimension_semantics<parallel>], iteration_bounds = array<i64: 1>, scalar_prefetch = 0 : i64, scratch_operands = 0 : i64, tpu.core_type = #tpu.core_type<tc>, window_params = [{transform_indices = @transform_0, window_bounds = array<i64: 16, 128>}, {pipeline_mode = #tpu.pipeline_mode<synchronous>, transform_indices = @transform_1, window_bounds = array<i64: 1, 128>}, {pipeline_mode = #tpu.pipeline_mode<synchronous>, transform_indices = @transform_2, window_bounds = array<i64: 1, 128>}, {transform_indices = @transform_3, window_bounds = array<i64: 16, 128>}]} {
    %c0 = arith.constant 0 : index
    %c0_0 = arith.constant 0 : index
    %0 = vector.load %arg1[%c0, %c0_0] : memref<16x128xf32, #tpu.memory_space<vmem>>, vector<16x128xf32>
    %cst = arith.constant dense<0.000000e+00> : vector<16xf32>
    %1 = vector.multi_reduction <add>, %0, %cst [1] : vector<16x128xf32> to vector<16xf32>
    %2 = vector.shape_cast %1 : vector<16xf32> to vector<16x1xf32>
    %cst_1 = arith.constant 1.280000e+02 : f32
    %3 = vector.broadcast %cst_1 : f32 to vector<16x1xf32>
    %4 = arith.divf %2, %3 : vector<16x1xf32>
    %5 = vector.broadcast %4 : vector<16x1xf32> to vector<16x128xf32>
    %6 = arith.subf %0, %5 : vector<16x128xf32>
    %7 = arith.mulf %6, %6 : vector<16x128xf32>
    %cst_2 = arith.constant dense<0.000000e+00> : vector<16xf32>
    %8 = vector.multi_reduction <add>, %7, %cst_2 [1] : vector<16x128xf32> to vector<16xf32>
    %9 = vector.shape_cast %8 : vector<16xf32> to vector<16x1xf32>
    %cst_3 = arith.constant 1.280000e+02 : f32
    %10 = vector.broadcast %cst_3 : f32 to vector<16x1xf32>
    %11 = arith.divf %9, %10 : vector<16x1xf32>
    %cst_4 = arith.constant 9.99999996E-13 : f32
    %12 = vector.broadcast %cst_4 : f32 to vector<16x1xf32>
    %13 = arith.addf %11, %12 : vector<16x1xf32>
    %14 = math.rsqrt %13 : vector<16x1xf32>
    %15 = vector.broadcast %14 : vector<16x1xf32> to vector<16x128xf32>
    %16 = arith.mulf %6, %15 : vector<16x128xf32>
    %c0_5 = arith.constant 0 : index
    %c0_6 = arith.constant 0 : index
    %17 = vector.load %arg2[%c0_5, %c0_6] : memref<1x128xf32, #tpu.memory_space<vmem>>, vector<1x128xf32>
    %18 = vector.broadcast %17 : vector<1x128xf32> to vector<16x128xf32>
    %19 = arith.mulf %16, %18 : vector<16x128xf32>
    %c0_7 = arith.constant 0 : index
    %c0_8 = arith.constant 0 : index
    %20 = vector.load %arg3[%c0_7, %c0_8] : memref<1x128xf32, #tpu.memory_space<vmem>>, vector<1x128xf32>
    %21 = vector.broadcast %20 : vector<1x128xf32> to vector<16x128xf32>
    %22 = arith.addf %19, %21 : vector<16x128xf32>
    %c0_9 = arith.constant 0 : index
    %c0_10 = arith.constant 0 : index
    %23 = vector.load %arg4[%c0_9, %c0_10] : memref<16x128xf32, #tpu.memory_space<vmem>>, vector<16x128xf32>
    tpu.vector_store %arg4[%c0_9, %c0_10], %22 {strides = array<i32>} : memref<16x128xf32, #tpu.memory_space<vmem>>, vector<16x128xf32>,
    return
  }
  func.func @transform_0(%arg0: i32) -> (i32, i32) {
    %c0_i32 = arith.constant 0 : i32
    %c0_i32_0 = arith.constant 0 : i32
    return %arg0, %c0_i32 : i32, i32
  }
  func.func @transform_1(%arg0: i32) -> (i32, i32) {
    %c0_i32 = arith.constant 0 : i32
    %c0_i32_0 = arith.constant 0 : i32
    %c0_i32_1 = arith.constant 0 : i32
    return %c0_i32, %c0_i32_0 : i32, i32
  }
  func.func @transform_2(%arg0: i32) -> (i32, i32) {
    %c0_i32 = arith.constant 0 : i32
    %c0_i32_0 = arith.constant 0 : i32
    %c0_i32_1 = arith.constant 0 : i32
    return %c0_i32, %c0_i32_0 : i32, i32
  }
  func.func @transform_3(%arg0: i32) -> (i32, i32) {
    %c0_i32 = arith.constant 0 : i32
    %c0_i32_0 = arith.constant 0 : i32
    return %arg0, %c0_i32 : i32, i32
  }
}

</mosaic_0001>

<bundles_post_ra>
// kernel: tpu_custom_call.1
= control target key start
LH: loop header
LB: loop body
LE: loop exit
PB: predicated region body
PF: predicated region fallthrough
CT: control target
= control target key end

     0   :  { %8 = vsyncpa [#allocation3], 0  ;;  %s264_s0 = inlined_call_operand.hbm [shape: f32[16,128], index: 0, kind: input, shape index: {}]   ;;  %s265_s1 = inlined_call_operand.hbm [shape: f32[1,128], index: 1, kind: input, shape index: {}]   ;;  %s266_s2 = inlined_call_operand.vmem [shape: f32[1,128], index: 2, kind: input, shape index: {}]   ;;  %s267_s3 = inlined_call_operand.hbm [shape: f32[16,128], index: 3, kind: output, shape index: {}]  }
   0x1   :  { %9 = vsyncpa [#allocation6], 0 }
   0x2   :  { %10 = vsyncpa [#allocation4], 0  ;;  %s15_s14 = sshll.u32 %s264_s0, 4  ;;  %s220_s15 = smov [#allocation2]   ;;  %s16_s14 = int_to_ptr.hbm [resolvable:$true] %s15_s14 }
   0x3   :  { %s17_s16 = sshll.u32 %s220_s15, 4  ;;  %s29_s19 = sshll.u32 %s265_s1, 4  ;;  %s18_s16 = int_to_ptr.vmem [resolvable:$true] %s17_s16  ;;  %s30_s19 = int_to_ptr.hbm [resolvable:$true] %s29_s19 }
   0x4   :  { %s221_s20 = smov 128   ;;  %s222_s21 = smov 8  }
   0x5   :  { %23 = dma.hbm_to_vmem [thread:$0]  %s16_s14, 256, %s18_s16, [#allocation3], %s221_s20, %s221_s20, %s222_s21  }
   0x6   :  { %s223_s22 = smov [#allocation5]  }
   0x7   :  { %s31_s23 = sshll.u32 %s223_s22, 4  ;;  %s32_s23 = int_to_ptr.vmem [resolvable:$true] %s31_s23 }
   0x8   :  { %34 = dma.hbm_to_vmem [thread:$0]  %s30_s19, 16, %s32_s23, [#allocation6]  }
   0x9   :  { %214 = dma.done.wait [#allocation3], 256  }
   0xa   :  { %215 = vsyncadd [#allocation3], 4294967040 }
   0xb   :  { %216 = dma.done.wait [#allocation6], 16  }
   0xc   :  { %217 = vsyncadd [#allocation6], 4294967280  ;;  %v45_v0 = vld [vmem:[#allocation2] sm:$0xff]  ;;  %v46_v1 = vld [vmem:[#allocation2 + $0x8] sm:$0xff]  ;;  %v224_v2 = vmov 128.0   ;;  %s225_s24 = smov [#allocation7]  }
   0xd   :  { %47 = vadd.xlane.f32.xlu0 %v45_v0  ;;  %136 = vrcp.f32 %v224_v2  ;;  %v134_v31 = vld [vmem:[#allocation5] ss:$0 sm:$0xff]  ;;  %v135_v35 = vld [vmem:[%s266_s2] ss:$0 sm:$0xff]  ;;  %s112_s25 = sshll.u32 %s225_s24, 4  ;;  %s114_s28 = sshll.u32 %s267_s3, 4  ;;  %s113_s25 = int_to_ptr.vmem [resolvable:$true] %s112_s25  ;;  %s115_s28 = int_to_ptr.hbm [resolvable:$true] %s114_s28 }
  0x13   :  { %v137_v3 = vpop.eup %136 }
  0x14   :  { %v52_v4 = vmul.f32 128.0, %v137_v3  ;;  %vm56_vm0 = vweird.f32 %v137_v3 }
  0x15   :  { %49 = vadd.xlane.f32.xlu0 %v46_v1 }
  0x16   :  { %v53_v5 = vsub.f32 1.0, %v52_v4 }
  0x18   :  { %v54_v6 = vmul.f32 %v137_v3, %v53_v5 }
  0x1a   :  { %v55_v7 = vadd.f32 %v137_v3, %v54_v6 }
  0x1c   :  { %v57_v8 = vsel %vm56_vm0, %v137_v3, %v55_v7 }
  0x80   :  { %v48_v9 = vpop.xlane.xlu0 %47 }
  0x81   :  { %v58_v10 = vmul.f32 %v57_v8, %v48_v9 }
  0x83   :  { %v60_v11 = vsub.f32 %v45_v0, %v58_v10 }
  0x85   :  { %v62_v12 = vmul.f32 %v60_v11, %v60_v11 }
  0x87   :  { %64 = vadd.xlane.f32.xlu1 %v62_v12 }
  0x88   :  { %v50_v13 = vpop.xlane.xlu0 %49 }
  0x89   :  { %v59_v14 = vmul.f32 %v57_v8, %v50_v13 }
  0x8b   :  { %v61_v15 = vsub.f32 %v46_v1, %v59_v14 }
  0x8d   :  { %v63_v16 = vmul.f32 %v61_v15, %v61_v15 }
  0x8f   :  { %66 = vadd.xlane.f32.xlu1 %v63_v16 }
  0xfa   :  { %v65_v17 = vpop.xlane.xlu1 %64 }
  0xfb   :  { %v68_v18 = vmul.f32 %v65_v17, %v57_v8 }
  0xfd   :  { %v70_v19 = vadd.f32 1e-12, %v68_v18 }
  0xff   :  { %138 = vrsqrt.f32 %v70_v19  ;;  %vm78_vm2 = vweird.f32 %v70_v19 }
 0x102   :  { %v67_v20 = vpop.xlane.xlu1 %66 }
 0x103   :  { %v69_v21 = vmul.f32 %v67_v20, %v57_v8 }
 0x105   :  { %v139_v22 = vpop.eup %138  ;;  %v71_v23 = vadd.f32 1e-12, %v69_v21 }
 0x106   :  { %v73_v24 = vmul.f32 %v139_v22, %v70_v19  ;;  %vm79_vm1 = vweird.f32 %v139_v22 }
 0x107   :  { %140 = vrsqrt.f32 %v71_v23  ;;  %vm80_vm3 = vmor %vm78_vm2, %vm79_vm1  ;;  %vm88_vm5 = vweird.f32 %v71_v23 }
 0x108   :  { %v74_v25 = vmul.f32 %v139_v22, %v73_v24 }
 0x10a   :  { %v75_v26 = vmul.f32 0.5, %v74_v25 }
 0x10c   :  { %v76_v27 = vsub.f32 1.5, %v75_v26 }
 0x10d   :  { %v141_v28 = vpop.eup %140 }
 0x10e   :  { %v77_v29 = vmul.f32 %v139_v22, %v76_v27  ;;  %v83_v30 = vmul.f32 %v141_v28, %v71_v23  ;;  %vm89_vm4 = vweird.f32 %v141_v28 }
 0x10f   :  { %vm90_vm6 = vmor %vm88_vm5, %vm89_vm4 }
 0x110   :  { %v81_v32 = vsel %vm80_vm3, %v139_v22, %v77_v29  ;;  %v84_v33 = vmul.f32 %v141_v28, %v83_v30 }
 0x111   :  { %v92_v34 = vmul.f32 %v81_v32, %v60_v11 }
 0x112   :  { %v85_v36 = vmul.f32 0.5, %v84_v33 }
 0x113   :  { %v98_v37 = vmul.f32 %v134_v31, %v92_v34 }
 0x114   :  { %v86_v38 = vsub.f32 1.5, %v85_v36 }
 0x115   :  { %v104_v39 = vadd.f32 %v135_v35, %v98_v37 }
 0x116   :  { %v87_v40 = vmul.f32 %v141_v28, %v86_v38 }
 0x117   :  { %106 = vst [vmem:[#allocation7] sm:$0xff] %v104_v39 }
 0x118   :  { %v91_v41 = vsel %vm90_vm6, %v141_v28, %v87_v40 }
 0x119   :  { %v93_v42 = vmul.f32 %v91_v41, %v61_v15 }
 0x11b   :  { %v99_v43 = vmul.f32 %v134_v31, %v93_v42 }
 0x11d   :  { %v105_v44 = vadd.f32 %v135_v35, %v99_v43 }
 0x11f   :  { %107 = vst [vmem:[#allocation7 + $0x8] sm:$0xff] %v105_v44 }
 0x120   :  { %120 = dma.vmem_to_hbm [thread:$0]  %s113_s25, 256, %s115_s28, [#allocation4], %s221_s20, %s221_s20, %s222_s21  }
 0x121   :  { %218 = dma.done.wait [#allocation4], 256  }
 0x122   :  { %219 = vsyncadd [#allocation4], 4294967040 }
 0x123   :  { %125 = vsyncpa [#allocation3], 1 }
 0x124   :  { %126 = vsyncpa [#allocation6], 1 }
 0x125   :  { %127 = vsyncpa [#allocation4], 1 }

</bundles_post_ra>
